<compile_context>
chip_gen: v7x
topology: tpu7x:2x2x1
jax: 0.10.0
libtpu: 0.0.40
codegen_flags: <defaults>
</compile_context>

<pallas_src>
import functools

import numpy as np
import jax
import jax.numpy as jnp
from jax.experimental import pallas as pl
from jax.experimental.pallas import tpu as pltpu


def _round_up(x: int, m: int) -> int:
    return (x + m - 1) // m * m


def _num_tensorcores() -> int:
    try:
        info = pltpu.get_tpu_info()
        for attr in ("num_cores", "core_count", "num_tensorcores",
                     "tensor_cores", "num_tensor_cores"):
            v = getattr(info, attr, None)
            if v:
                return max(1, min(2, int(v)))
    except Exception:
        pass
    return 1


def _vmem_capacity_bytes() -> int:
    try:
        info = pltpu.get_tpu_info()
        v = int(getattr(info, "vmem_capacity_bytes", 0))
        if v > 0:
            return v
    except Exception:
        pass
    return 64 << 20


def _lagrange_kernel(p_ref, h_ref, e_ref, g_ref, out_ref, acc_ref, *,
                     w, n_total, tile_n, steps):
    """One (tile_n, W) / (tile_n, W*W) batch tile in flat lane-dense layout."""
    c = pl.program_id(0)          # parallel (slice) axis
    i = pl.program_id(1)          # reduction (batch-tile) axis

    @pl.when(i == 0)
    def _init():
        acc_ref[...] = jnp.zeros_like(acc_ref)

    f32 = jnp.float32
    p = p_ref[...].astype(f32)            # (TN, W)
    hf = h_ref[...].astype(f32)           # (TN, W*W)  flat, lane-dense
    e_mat = e_ref[...]                    # (W, W*W)   bf16 0/1: expand p -> flat
    g_mat = g_ref[...]                    # (W*W, 2W)  bf16 0/1: [colsum | diag]

    def exact_dot(x, m_bf16):
        # f32-accurate MXU matmul against an exactly-representable 0/1 matrix:
        # hi + lo reconstructs x to ~2^-18 relative, products are exact in bf16.
        hi = x.astype(jnp.bfloat16)
        lo = (x - hi.astype(f32)).astype(jnp.bfloat16)
        return (jnp.dot(hi, m_bf16, preferred_element_type=f32)
                + jnp.dot(lo, m_bf16, preferred_element_type=f32))

    # p_rep[n, i*W + j] = p[n, i]  (flat broadcast of p, built on the MXU)
    p_rep = exact_dot(p, e_mat)                       # (TN, W*W)
    h_gain = p_rep * hf                               # (TN, W*W)

    # One pass over h_gain yields both reductions:
    #   sd[:, :W] = column sums S[n,j] = sum_i h_gain[n,i,j]
    #   sd[:, W:] = diagonal    num[n,j] = h_gain[n,j,j]
    sd = exact_dot(h_gain, g_mat)                     # (TN, 2W)
    col_sum = sd[:, :w]
    num = sd[:, w:]
    denom = col_sum - num + 1.0                       # off-diag column sum + 1
    terms = jnp.log1p(num / denom)                    # (TN, W)

    # Mask the ragged tail (rows >= N) instead of padding h in HBM.
    start = (c * steps + i) * tile_n
    rows = start + jax.lax.broadcasted_iota(jnp.int32, (tile_n, w), 0)
    terms = jnp.where(rows < n_total, terms, 0.0)

    acc_ref[...] += terms

    @pl.when(i == pl.num_programs(1) - 1)
    def _finalize():
        out_ref[...] = jnp.zeros_like(out_ref) + jnp.sum(acc_ref[...])


def lagrange_forward(approx, h, *, num_slices=None, max_tile_n=None):
    """approx: (N, W), h: (N, W, W)  ->  scalar f32 = mean_n(-objective[n])."""
    n, w = approx.shape
    assert h.shape == (n, w, w)
    w2 = w * w

    h_flat = h.reshape(n, w2)             # free: contiguous row-major view

    # Constant 0/1 selector matrices (exact in bf16).
    #   E[i, i*W + j] = 1                 -> p @ E = flat broadcast of p
    #   G[:, :W]  column-sum selector     (l % W == j)
    #   G[:, W:]  diagonal selector       (l == j*(W+1))
    l_idx = np.arange(w2)
    e_np = (l_idx[None, :] // w == np.arange(w)[:, None])
    f_np = (l_idx[:, None] % w == np.arange(w)[None, :])
    d_np = (l_idx[:, None] == (np.arange(w) * (w + 1))[None, :])
    e_mat = jnp.asarray(e_np, dtype=jnp.bfloat16)
    g_mat = jnp.asarray(np.concatenate([f_np, d_np], axis=1), dtype=jnp.bfloat16)

    # ---- per-generation VMEM budget -> tile size (dense flat footprint) ----
    phys = _vmem_capacity_bytes()
    vmem_limit = (44 << 20) if phys <= (72 << 20) else (96 << 20)
    w2_lanes = _round_up(w2, 128)
    # double-buffered h + f32/bf16 temporaries (p_rep, h_gain, hi/lo) +
    # lane-padded (TN, W) temporaries + accumulator (conservative estimate).
    per_sample = 4 * (6 * w2_lanes + 12 * max(128, _round_up(w, 128)))
    const_bytes = 2 * 2 * (w * w2 + w2 * 2 * w)       # E & G, double-buffered
    budget = max(1 << 20, int(vmem_limit * 0.75) - const_bytes)
    max_tile = max(8, min(8192, (budget // per_sample) // 8 * 8))
    if max_tile_n is not None:
        max_tile = max(8, min(max_tile, _round_up(int(max_tile_n), 8)))

    tile_n = min(max_tile, _round_up(n, 8))

    cores = _num_tensorcores() if num_slices is None else max(1, int(num_slices))
    if num_slices is None and cores > 1:
        # Give each core >= 2 pipeline steps when the batch is big enough.
        if pl.cdiv(n, tile_n) < 2 * cores and n >= 32 * cores:
            tile_n = max(8, min(tile_n, _round_up(pl.cdiv(n, 2 * cores), 8)))

    n_blocks = pl.cdiv(n, tile_n)                     # row blocks actually needed
    if num_slices is None:
        slices = cores if n_blocks >= 2 * cores else 1
    else:
        slices = max(1, min(cores, n_blocks))
    steps = pl.cdiv(n_blocks, slices)
    last_blk = n_blocks - 1

    def row_map(c, i):
        # Clamp so a trailing (empty) step never indexes past the array; its
        # contribution is zeroed by the in-kernel row mask anyway.
        return (jnp.minimum(c * steps + i, last_blk), 0)

    kernel = functools.partial(_lagrange_kernel, w=w, n_total=n,
                               tile_n=tile_n, steps=steps)

    partials = pl.pallas_call(
        kernel,
        out_shape=jax.ShapeDtypeStruct((slices, 1, 1), jnp.float32),
        grid_spec=pltpu.PrefetchScalarGridSpec(
            num_scalar_prefetch=0,
            grid=(slices, steps),                     # reduction axis last
            in_specs=[
                pl.BlockSpec((tile_n, w), row_map),
                pl.BlockSpec((tile_n, w2), row_map),
                pl.BlockSpec((w, w2), lambda c, i: (0, 0)),
                pl.BlockSpec((w2, 2 * w), lambda c, i: (0, 0)),
            ],
            out_specs=pl.BlockSpec((1, 1, 1), lambda c, i: (c, 0, 0)),
            scratch_shapes=[pltpu.VMEM((tile_n, w), jnp.float32)],
        ),
        compiler_params=pltpu.CompilerParams(
            dimension_semantics=("parallel", "arbitrary"),
            vmem_limit_bytes=vmem_limit,
        ),
    )(approx, h_flat, e_mat, g_mat)

    # mean_n(-objective[n]) = -(sum of per-sample objectives) / N
    return -jnp.sum(partials) / jnp.float32(n)


def lagrange_reference(approx, h):
    """Pure-JAX reference matching the PyTorch semantics."""
    h_gain = approx[:, :, None] * h
    diag = jnp.einsum("njj->nj", h_gain)
    denom = jnp.sum(h_gain, axis=1) - diag + 1.0
    obj = jnp.sum(jnp.log1p(diag / denom), axis=1)
    return jnp.mean(-obj)


if __name__ == "__main__":
    key = jax.random.PRNGKey(0)
    k1, k2 = jax.random.split(key)

    N, W = 50, 16  # Lagrange has no fixed sizes; small shapes, N not tile-aligned
    # Positive inputs so log(1 + num/denom) is well defined (power allocation).
    approx = jax.random.uniform(k1, (N, W), jnp.float32, minval=0.1, maxval=1.0)
    h = jax.random.uniform(k2, (N, W, W), jnp.float32, minval=0.1, maxval=1.0)

    ref = jax.block_until_ready(lagrange_reference(approx, h))

    # Production path: auto tile / slice selection, single partial block.
    out = jax.block_until_ready(lagrange_forward(approx, h))
    assert jnp.allclose(out, ref, rtol=1e-4, atol=1e-4), (out, ref)

    # Forced small tile: multi-step accumulation + partial-edge-block masking.
    out_small = jax.block_until_ready(
        lagrange_forward(approx, h, max_tile_n=8, num_slices=1))
    assert jnp.allclose(out_small, ref, rtol=1e-4, atol=1e-4), (out_small, ref)

    # Forced two slices: per-slice private partials + masking across slices.
    out_sliced = jax.block_until_ready(
        lagrange_forward(approx, h, max_tile_n=16, num_slices=2))
    assert jnp.allclose(out_sliced, ref, rtol=1e-4, atol=1e-4), (out_sliced, ref)

    print("KERNEL_OK")
</pallas_src>

<mosaic_0001>
module attributes {stable_mosaic.version = 11 : i64} {
  func.func @_lagrange_kernel(%arg0: i32, %arg1: i32, %arg2: memref<56x16xf32, #tpu.memory_space<vmem>>, %arg3: memref<56x256xf32, #tpu.memory_space<vmem>>, %arg4: memref<16x256xbf16, #tpu.memory_space<vmem>>, %arg5: memref<256x32xbf16, #tpu.memory_space<vmem>>, %arg6: memref<1x1x1xf32, #tpu.memory_space<vmem>>, %arg7: memref<56x16xf32, #tpu.memory_space<vmem>>) attributes {dimension_semantics = [#tpu.dimension_semantics<parallel>, #tpu.dimension_semantics<arbitrary>], iteration_bounds = array<i64: 1, 1>, scalar_prefetch = 0 : i64, scratch_operands = 1 : i64, tpu.core_type = #tpu.core_type<tc>, window_params = [{transform_indices = @transform_0, window_bounds = array<i64: 56, 16>}, {transform_indices = @transform_1, window_bounds = array<i64: 56, 256>}, {pipeline_mode = #tpu.pipeline_mode<synchronous>, transform_indices = @transform_2, window_bounds = array<i64: 16, 256>}, {pipeline_mode = #tpu.pipeline_mode<synchronous>, transform_indices = @transform_3, window_bounds = array<i64: 256, 32>}, {transform_indices = @transform_4, window_bounds = array<i64: 1, 1, 1>}]} {
    %c0_i32 = arith.constant 0 : i32
    %0 = arith.cmpi eq, %arg1, %c0_i32 : i32
    %1 = arith.extui %0 : i1 to i32
    %c0_i32_0 = arith.constant 0 : i32
    %2 = arith.cmpi ne, %1, %c0_i32_0 : i32
    scf.if %2 {
      %cst_19 = arith.constant 0.000000e+00 : f32
      %45 = vector.broadcast %cst_19 : f32 to vector<56x16xf32>
      %c0_20 = arith.constant 0 : index
      %c0_21 = arith.constant 0 : index
      %46 = vector.load %arg7[%c0_20, %c0_21] : memref<56x16xf32, #tpu.memory_space<vmem>>, vector<56x16xf32>
      tpu.vector_store %arg7[%c0_20, %c0_21], %45 {strides = array<i32>} : memref<56x16xf32, #tpu.memory_space<vmem>>, vector<56x16xf32>,
    } else {
    }
    %c0 = arith.constant 0 : index
    %c0_1 = arith.constant 0 : index
    %3 = vector.load %arg2[%c0, %c0_1] : memref<56x16xf32, #tpu.memory_space<vmem>>, vector<56x16xf32>
    %c0_2 = arith.constant 0 : index
    %c0_3 = arith.constant 0 : index
    %4 = vector.load %arg3[%c0_2, %c0_3] : memref<56x256xf32, #tpu.memory_space<vmem>>, vector<56x256xf32>
    %c0_4 = arith.constant 0 : index
    %c0_5 = arith.constant 0 : index
    %5 = vector.load %arg4[%c0_4, %c0_5] : memref<16x256xbf16, #tpu.memory_space<vmem>>, vector<16x256xbf16>
    %c0_6 = arith.constant 0 : index
    %c0_7 = arith.constant 0 : index
    %6 = vector.load %arg5[%c0_6, %c0_7] : memref<256x32xbf16, #tpu.memory_space<vmem>>, vector<256x32xbf16>
    %7 = arith.truncf %3 : vector<56x16xf32> to vector<56x16xbf16>
    %8 = arith.extf %7 : vector<56x16xbf16> to vector<56x16xf32>
    %9 = arith.subf %3, %8 : vector<56x16xf32>
    %10 = arith.truncf %9 : vector<56x16xf32> to vector<56x16xbf16>
    %cst = arith.constant dense<0.000000e+00> : vector<56x256xf32>
    %11 = tpu.matmul %7, %5, %cst {dimension_numbers = #tpu.dot_dimension_numbers<[1], [0], [0], [1], [0, 0, 1, 1], [], []>} : vector<56x16xbf16>, vector<16x256xbf16>, vector<56x256xf32> -> vector<56x256xf32>
    %cst_8 = arith.constant dense<0.000000e+00> : vector<56x256xf32>
    %12 = tpu.matmul %10, %5, %cst_8 {dimension_numbers = #tpu.dot_dimension_numbers<[1], [0], [0], [1], [0, 0, 1, 1], [], []>} : vector<56x16xbf16>, vector<16x256xbf16>, vector<56x256xf32> -> vector<56x256xf32>
    %13 = arith.addf %11, %12 : vector<56x256xf32>
    %14 = arith.mulf %13, %4 : vector<56x256xf32>
    %15 = arith.truncf %14 : vector<56x256xf32> to vector<56x256xbf16>
    %16 = arith.extf %15 : vector<56x256xbf16> to vector<56x256xf32>
    %17 = arith.subf %14, %16 : vector<56x256xf32>
    %18 = arith.truncf %17 : vector<56x256xf32> to vector<56x256xbf16>
    %cst_9 = arith.constant dense<0.000000e+00> : vector<56x32xf32>
    %19 = tpu.matmul %15, %6, %cst_9 {dimension_numbers = #tpu.dot_dimension_numbers<[1], [0], [0], [1], [0, 0, 1, 1], [], []>} : vector<56x256xbf16>, vector<256x32xbf16>, vector<56x32xf32> -> vector<56x32xf32>
    %cst_10 = arith.constant dense<0.000000e+00> : vector<56x32xf32>
    %20 = tpu.matmul %18, %6, %cst_10 {dimension_numbers = #tpu.dot_dimension_numbers<[1], [0], [0], [1], [0, 0, 1, 1], [], []>} : vector<56x256xbf16>, vector<256x32xbf16>, vector<56x32xf32> -> vector<56x32xf32>
    %21 = arith.addf %19, %20 : vector<56x32xf32>
    %22 = vector.extract_strided_slice %21 {offsets = [0, 0], sizes = [56, 16], strides = [1, 1]} : vector<56x32xf32> to vector<56x16xf32>
    %23 = vector.extract_strided_slice %21 {offsets = [0, 16], sizes = [56, 16], strides = [1, 1]} : vector<56x32xf32> to vector<56x16xf32>
    %24 = arith.subf %22, %23 : vector<56x16xf32>
    %cst_11 = arith.constant 1.000000e+00 : f32
    %25 = vector.broadcast %cst_11 : f32 to vector<56x16xf32>
    %26 = arith.addf %24, %25 : vector<56x16xf32>
    %27 = arith.divf %23, %26 : vector<56x16xf32>
    %28 = math.log1p %27 : vector<56x16xf32>
    %c1_i32 = arith.constant 1 : i32
    %29 = arith.muli %arg0, %c1_i32 : i32
    %30 = arith.addi %29, %arg1 : i32
    %c56_i32 = arith.constant 56 : i32
    %31 = arith.muli %30, %c56_i32 : i32
    %32 = tpu.iota {dimensions = array<i32: 0>} : vector<56x16xi32>
    %33 = vector.broadcast %31 : i32 to vector<56x16xi32>
    %34 = arith.addi %33, %32 : vector<56x16xi32>
    %c50_i32 = arith.constant 50 : i32
    %35 = vector.broadcast %c50_i32 : i32 to vector<56x16xi32>
    %36 = arith.cmpi slt, %34, %35 : vector<56x16xi32>
    %cst_12 = arith.constant 0.000000e+00 : f32
    %37 = vector.broadcast %cst_12 : f32 to vector<56x16xf32>
    %38 = arith.select %36, %28, %37 : vector<56x16xi1>, vector<56x16xf32>
    %c0_13 = arith.constant 0 : index
    %c0_14 = arith.constant 0 : index
    %39 = vector.load %arg7[%c0_13, %c0_14] : memref<56x16xf32, #tpu.memory_space<vmem>>, vector<56x16xf32>
    %40 = arith.addf %39, %38 : vector<56x16xf32>
    %c0_15 = arith.constant 0 : index
    %c0_16 = arith.constant 0 : index
    %41 = vector.load %arg7[%c0_15, %c0_16] : memref<56x16xf32, #tpu.memory_space<vmem>>, vector<56x16xf32>
    tpu.vector_store %arg7[%c0_15, %c0_16], %40 {strides = array<i32>} : memref<56x16xf32, #tpu.memory_space<vmem>>, vector<56x16xf32>,
    %c0_i32_17 = arith.constant 0 : i32
    %42 = arith.cmpi eq, %arg1, %c0_i32_17 : i32
    %43 = arith.extui %42 : i1 to i32
    %c0_i32_18 = arith.constant 0 : i32
    %44 = arith.cmpi ne, %43, %c0_i32_18 : i32
    scf.if %44 {
      %cst_19 = arith.constant 0.000000e+00 : f32
      %45 = vector.broadcast %cst_19 : f32 to vector<1x1x1xf32>
      %c0_20 = arith.constant 0 : index
      %c0_21 = arith.constant 0 : index
      %46 = vector.load %arg7[%c0_20, %c0_21] : memref<56x16xf32, #tpu.memory_space<vmem>>, vector<56x16xf32>
      %47 = vector.shape_cast %46 : vector<56x16xf32> to vector<1x56x16xf32>
      %cst_22 = arith.constant dense<0.000000e+00> : vector<1xf32>
      %48 = vector.multi_reduction <add>, %47, %cst_22 [1, 2] : vector<1x56x16xf32> to vector<1xf32>
      %49 = vector.shape_cast %48 : vector<1xf32> to vector<1x1x1xf32>
      %50 = vector.extract %49[0, 0, 0] : f32 from vector<1x1x1xf32>
      %51 = vector.broadcast %50 : f32 to vector<1x1x1xf32>
      %52 = arith.addf %45, %51 : vector<1x1x1xf32>
      %c0_23 = arith.constant 0 : index
      %c0_24 = arith.constant 0 : index
      %c0_25 = arith.constant 0 : index
      %53 = vector.load %arg6[%c0_23, %c0_24, %c0_25] : memref<1x1x1xf32, #tpu.memory_space<vmem>>, vector<1x1x1xf32>
      tpu.vector_store %arg6[%c0_23, %c0_24, %c0_25], %52 {strides = array<i32>} : memref<1x1x1xf32, #tpu.memory_space<vmem>>, vector<1x1x1xf32>,
    } else {
    }
    return
  }
  func.func @transform_0(%arg0: i32, %arg1: i32) -> (i32, i32) {
    %c1_i32 = arith.constant 1 : i32
    %0 = arith.muli %arg0, %c1_i32 : i32
    %1 = arith.addi %0, %arg1 : i32
    %c0_i32 = arith.constant 0 : i32
    %2 = arith.minsi %1, %c0_i32 : i32
    %c0_i32_0 = arith.constant 0 : i32
    %c0_i32_1 = arith.constant 0 : i32
    return %2, %c0_i32_0 : i32, i32
  }
  func.func @transform_1(%arg0: i32, %arg1: i32) -> (i32, i32) {
    %c1_i32 = arith.constant 1 : i32
    %0 = arith.muli %arg0, %c1_i32 : i32
    %1 = arith.addi %0, %arg1 : i32
    %c0_i32 = arith.constant 0 : i32
    %2 = arith.minsi %1, %c0_i32 : i32
    %c0_i32_0 = arith.constant 0 : i32
    %c0_i32_1 = arith.constant 0 : i32
    return %2, %c0_i32_0 : i32, i32
  }
  func.func @transform_2(%arg0: i32, %arg1: i32) -> (i32, i32) {
    %c0_i32 = arith.constant 0 : i32
    %c0_i32_0 = arith.constant 0 : i32
    %c0_i32_1 = arith.constant 0 : i32
    return %c0_i32, %c0_i32_0 : i32, i32
  }
  func.func @transform_3(%arg0: i32, %arg1: i32) -> (i32, i32) {
    %c0_i32 = arith.constant 0 : i32
    %c0_i32_0 = arith.constant 0 : i32
    %c0_i32_1 = arith.constant 0 : i32
    return %c0_i32, %c0_i32_0 : i32, i32
  }
  func.func @transform_4(%arg0: i32, %arg1: i32) -> (i32, i32, i32) {
    %c0_i32 = arith.constant 0 : i32
    %c0_i32_0 = arith.constant 0 : i32
    %c0_i32_1 = arith.constant 0 : i32
    return %arg0, %c0_i32, %c0_i32_0 : i32, i32, i32
  }
}

</mosaic_0001>

<bundles_post_ra>
// kernel: tpu_custom_call.1
= control target key start
LH: loop header
LB: loop body
LE: loop exit
PB: predicated region body
PF: predicated region fallthrough
CT: control target
= control target key end

     0   :  { %v1140_v2 = vmov 0   ;;  %vm90_vm0 = vcmask 130048   ;;  %s1485_s0 = inlined_call_operand.vmem [shape: f32[50,16], index: 0, kind: input, shape index: {}]   ;;  %s1486_s1 = inlined_call_operand.vmem [shape: f32[50,256], index: 1, kind: input, shape index: {}]   ;;  %s1487_s2 = inlined_call_operand.vmem [shape: bf16[16,256], index: 2, kind: input, shape index: {}]   ;;  %s1488_s3 = inlined_call_operand.vmem [shape: bf16[256,32], index: 3, kind: input, shape index: {}]   ;;  %s1489_s4 = inlined_call_operand.hbm [shape: f32[1,1,1], index: 4, kind: output, shape index: {}]  }
   0x1   :  { %v1069_v0 = vld [vmem:[%s1487_s2 + $0x4] ss:$8 sps:$4 sm:$0xff]   ;;  %v1071_v1 = vld [vmem:[%s1487_s2] ss:$8 sps:$4 sm:$0xff]   ;;  %230 = vmatprep.mubr.bf16.mxu0 %v1140_v2  ;;  %v100_v6 = vld [vmem:[%s1485_s0 + $0x10] sm:$0xff] }
   0x2   :  { %v98_v3 = vld [vmem:[%s1485_s0] sm:$0xff]  ;;  %v99_v4 = vld [vmem:[%s1485_s0 + $0x8] sm:$0xff]  ;;  %198 = vmatprep.subr.bf16.mxu0 %v1069_v0  ;;  %v101_v7 = vld [vmem:[%s1485_s0 + $0x18] sm:$0xff] }
   0x3   :  { %v1183_v5 = vpack.c.bf16 %v99_v4, %v98_v3  ;;  %199 = vmatpush1.bf16.msra.mxu0 %v1071_v1  ;;  %v1191_v8 = vpack.c.bf16 %v101_v7, %v100_v6  ;;  %v1198_v11 = vld [vmem:[%s1488_s3 + $0x40] sm:$0xff]   ;;  %v1213_v18 = vld [vmem:[%s1488_s3 + $0x48] sm:$0xff]   ;;  %v1231_v25 = vld [vmem:[%s1488_s3 + $0x50] sm:$0xff]  }
   0x4   :  { %281 = vmatprep.subr.bf16.mxu0 %v1069_v0  ;;  %v102_v12 = vld [vmem:[%s1485_s0 + $0x20] sm:$0xff]  ;;  %950 = vmatprep.subr.bf16.mxu1 %v1198_v11  ;;  %v103_v19 = vld [vmem:[%s1485_s0 + $0x28] sm:$0xff]  ;;  %v1239_v29 = vld [vmem:[%s1488_s3 + $0x10] sm:$0xff]  }
   0x5   :  { %v157_v9 = vunpack.c.l.bf16 %v1183_v5  ;;  %v158_v10 = vunpack.c.h.bf16 %v1183_v5  ;;  %v1206_v13 = vld [vmem:[%s1488_s3] sm:$0xff]   ;;  %v159_v16 = vunpack.c.l.bf16 %v1191_v8  ;;  %v160_v17 = vunpack.c.h.bf16 %v1191_v8  ;;  %v1225_v24 = vld [vmem:[%s1488_s3 + $0x8] sm:$0xff]   ;;  %v104_v30 = vld [vmem:[%s1485_s0 + $0x30] sm:$0xff] }
   0x6   :  { %951 = vmatpush3.bf16.msra.mxu1 %v1206_v13  ;;  %v155_v23 = vpack.c.bf16 %v103_v19, %v102_v12  ;;  %v1247_v31 = vld [vmem:[%s1488_s3 + $0x58] sm:$0xff]   ;;  %v156_v35 = vpack.c.bf16 %v104_v30, %v104_v30 }
   0x7   :  { %v164_v14 = vsub.f32 %v98_v3, %v157_v9  ;;  %v165_v15 = vsub.f32 %v99_v4, %v158_v10  ;;  %952 = vmatprep.subr.bf16.mxu1 %v1213_v18  ;;  %v166_v21 = vsub.f32 %v100_v6, %v159_v16  ;;  %v167_v22 = vsub.f32 %v101_v7, %v160_v17  ;;  %v1252_v32 = vld [vmem:[%s1488_s3 + $0x18] sm:$0xff]  }
   0x8   :  { %v161_v27 = vunpack.c.l.bf16 %v155_v23  ;;  %v162_v28 = vunpack.c.h.bf16 %v155_v23 }
   0x9   :  { %v171_v20 = vpack.c.bf16 %v165_v15, %v164_v14  ;;  %v172_v26 = vpack.c.bf16 %v167_v22, %v166_v21 }
   0xa   :  { %953 = vmatpush3.bf16.msra.mxu1 %v1225_v24  ;;  %v168_v33 = vsub.f32 %v102_v12, %v161_v27  ;;  %v169_v34 = vsub.f32 %v103_v19, %v162_v28 }
   0xb   :  { %926 = vmatmul.mubr.msk.bf16.vlgmr.msra.gmra.mrb[0].mxu0 %vm90_vm0, %v171_v20  ;;  %954 = vmatprep.subr.bf16.mxu1 %v1231_v25 }
   0xc   :  { %282 = vmatpush1.bf16.msra.mxu0 %v1071_v1  ;;  %240 = vmatprep.mubr.bf16.mxu0 %v1140_v2 }
   0xd   :  { %990 = vmatprep.subr.bf16.mxu0 %v1198_v11 }
   0xe   :  { %955 = vmatpush3.bf16.msra.mxu1 %v1239_v29 }
   0xf   :  { %956 = vmatprep.subr.bf16.mxu1 %v1247_v31 }
  0x13   :  { %927 = vmatmul.mubr.msk.bf16.gmra.mrb[4].mxu0 %vm90_vm0, %v172_v26 }
  0x14   :  { %9 = vsyncpa [#allocation4], 0  ;;  %250 = vmatprep.mubr.bf16.mxu0 %v1140_v2  ;;  %v1261_v36 = vld [vmem:[%s1488_s3 + $0x60] sm:$0xff]   ;;  %957 = vmatpush3.bf16.msra.mxu1 %v1252_v32  ;;  %v173_v37 = vpack.c.bf16 %v169_v34, %v168_v33  ;;  %v163_v38 = vunpack.c.l.bf16 %v156_v35  ;;  %v1273_v40 = vld [vmem:[%s1488_s3 + $0x68] sm:$0xff]   ;;  %s1142_s9 = smov 16   ;;  %s1144_s10 = smov [#allocation3]  }
  0x15   :  { %958 = vmatprep.subr.bf16.mxu1 %v1261_v36  ;;  %v1268_v39 = vld [vmem:[%s1488_s3 + $0x20] sm:$0xff]   ;;  %v1281_v42 = vld [vmem:[%s1488_s3 + $0x28] sm:$0xff]   ;;  %v1310_v44 = vld [vmem:[%s1488_s3 + $0x70] sm:$0xff]   ;;  %s904_s11 = sshll.u32 %s1144_s10, 4  ;;  %vm896_vm9 = vcmask 0   ;;  %s905_s11 = int_to_ptr.vmem [resolvable:$true] %s904_s11 }
  0x16   :  { %v170_v41 = vsub.f32 %v104_v30, %v163_v38  ;;  %v1315_v45 = vld [vmem:[%s1488_s3 + $0x30] sm:$0xff]   ;;  %v1324_v46 = vld [vmem:[%s1488_s3 + $0x78] sm:$0xff]   ;;  %v105_v48 = vld [vmem:[%s1486_s1] sm:$0xff]  ;;  %s1116_s13 = scalar_lea.vmem %s905_s11, 16  ;;  %p1121_p1 = scmp.lt.s32.totalorder %s905_s11, %s905_s11 }
  0x17   :  { %v1329_v47 = vld [vmem:[%s1488_s3 + $0x38] sm:$0xff]   ;;  %v107_v50 = vld [vmem:[%s1486_s1 + $0x10] sm:$0xff]  ;;  %v106_v51 = vld [vmem:[%s1486_s1 + $0x8] sm:$0xff]  ;;  %p1117_p0 = scmp.ne.s32.totalorder %s905_s11, %s1116_s13  ;;  %s1120_s3 = scalar_lea.vmem %s905_s11, 32 }
  0x18   :  { %959 = vmatpush3.bf16.msra.mxu1 %v1268_v39  ;;  %v174_v43 = vpack.c.bf16 %v170_v41, %v170_v41  ;;  %v108_v53 = vld [vmem:[%s1486_s1 + $0x18] sm:$0xff]  ;;  %v109_v0 = vld [vmem:[%s1486_s1 + $0x20] sm:$0xff]  ;;  %v110_v6 = vld [vmem:[%s1486_s1 + $0x28] sm:$0xff]  ;;  %p1122_p2 = scmp.lt.s32.totalorder %s1120_s3, %s1116_s13 }
  0x19   :  { %960 = vmatprep.subr.bf16.mxu1 %v1273_v40  ;;  %v113_v33 = vld [vmem:[%s1486_s1 + $0x40] sm:$0xff]  ;;  %v114_v38 = vld [vmem:[%s1486_s1 + $0x48] sm:$0xff] }
  0x1a   :  { %p1123_p3 = por %p1122_p2, %p1121_p1 }
  0x1b   :  { %928 = vmatmul.mubr.msk.bf16.gmra.mrb[8].mxu0 %vm90_vm0, %v173_v37 }
  0x1c   :  { %260 = vmatprep.mubr.bf16.mxu0 %v1140_v2  ;;  %961 = vmatpush3.bf16.msra.mxu1 %v1281_v42  ;;  %p1124_p4 = pnand %p1123_p3, %p1117_p0 }
  0x1d   :  { %962 = vmatprep.subr.bf16.mxu1 %v1310_v44 }
  0x20   :  { %963 = vmatpush3.bf16.msra.mxu1 %v1315_v45 }
  0x21   :  { %964 = vmatprep.subr.bf16.mxu1 %v1324_v46 }
  0x23   :  { %929 = vmatmul.mubr.msk.bf16.gmra.mrb[12].mxu0 %vm90_vm0, %v174_v43 }
  0x24   :  { %313 = vmatprep.mubr.bf16.mxu0 %v1140_v2  ;;  %965 = vmatpush3.bf16.msra.mxu1 %v1329_v47 }
  0x25   :  { %1030 = vmatprep.subr.bf16.mxu1 %v1198_v11 }
  0x2b   :  { %930 = vmatmul.mubr.msk.bf16.vlgmr.msra.gmra.mrb[0].mxu0 %vm90_vm0, %v1183_v5 }
  0x2c   :  { %323 = vmatprep.mubr.bf16.mxu0 %v1140_v2  ;;  %991 = vmatpush3.bf16.msra.mxu0 %v1206_v13 }
  0x2d   :  { %992 = vmatprep.subr.bf16.mxu0 %v1213_v18 }
  0x30   :  { %993 = vmatpush3.bf16.msra.mxu0 %v1225_v24 }
  0x31   :  { %994 = vmatprep.subr.bf16.mxu0 %v1231_v25 }
  0x33   :  { %931 = vmatmul.mubr.msk.bf16.gmra.mrb[4].mxu0 %vm90_vm0, %v1191_v8  ;;  %v112_v8 = vld [vmem:[%s1486_s1 + $0x38] sm:$0xff] }
  0x34   :  { %333 = vmatprep.mubr.bf16.mxu0 %v1140_v2  ;;  %995 = vmatpush3.bf16.msra.mxu0 %v1239_v29 }
  0x35   :  { %996 = vmatprep.subr.bf16.mxu0 %v1247_v31 }
  0x38   :  { %997 = vmatpush3.bf16.msra.mxu0 %v1252_v32 }
  0x39   :  { %998 = vmatprep.subr.bf16.mxu0 %v1261_v36 }
  0x3b   :  { %932 = vmatmul.mubr.msk.bf16.gmra.mrb[8].mxu0 %vm90_vm0, %v155_v23 }
  0x3c   :  { %343 = vmatprep.mubr.bf16.mxu0 %v1140_v2  ;;  %999 = vmatpush3.bf16.msra.mxu0 %v1268_v39  ;;  %v111_v2 = vld [vmem:[%s1486_s1 + $0x30] sm:$0xff] }
  0x3d   :  { %1000 = vmatprep.subr.bf16.mxu0 %v1273_v40 }
  0x40   :  { %1001 = vmatpush3.bf16.msra.mxu0 %v1281_v42 }
  0x41   :  { %1002 = vmatprep.subr.bf16.mxu0 %v1310_v44 }
  0x43   :  { %933 = vmatmul.mubr.msk.bf16.gmra.mrb[12].mxu0 %vm90_vm0, %v156_v35  ;;  %v115_v35 = vld [vmem:[%s1486_s1 + $0x50] sm:$0xff] }
  0x44   :  { %1003 = vmatpush3.bf16.msra.mxu0 %v1315_v45 }
  0x45   :  { %1004 = vmatprep.subr.bf16.mxu0 %v1324_v46 }
  0x48   :  { %1005 = vmatpush3.bf16.msra.mxu0 %v1329_v47 }
  0xfe   :  { %v315_v49 = vpop.f32.mrb[0].mxu0 }
  0xff   :  { %v317_v52 = vpop.f32.mrb[1].mxu0  ;;  %v352_v55 = vmul.f32 %v315_v49, %v105_v48 }
 0x100   :  { %v319_v54 = vpop.f32.mrb[2].mxu0  ;;  %v353_v58 = vmul.f32 %v317_v52, %v106_v51 }
 0x101   :  { %v354_v56 = vmul.f32 %v319_v54, %v107_v50  ;;  %v321_v57 = vpop.f32.mrb[3].mxu0 }
 0x102   :  { %v355_v59 = vmul.f32 %v321_v57, %v108_v53 }
 0x103   :  { %v366_v60 = vpack.c.bf16 %v354_v56, %v352_v55 }
 0x104   :  { %v367_v61 = vpack.c.bf16 %v355_v59, %v353_v58 }
 0x105   :  { %v374_v62 = vunpack.c.l.bf16 %v366_v60  ;;  %v376_v63 = vunpack.c.h.bf16 %v366_v60 }
 0x106   :  { %v325_v1 = vpop.f32.mrb[4].mxu0  ;;  %602 = vmatprep.mubr.bf16.mxu0 %v367_v61  ;;  %v375_v3 = vunpack.c.l.bf16 %v367_v61  ;;  %v377_v4 = vunpack.c.h.bf16 %v367_v61 }
 0x107   :  { %v390_v5 = vsub.f32 %v354_v56, %v376_v63  ;;  %v327_v7 = vpop.f32.mrb[5].mxu0  ;;  %603 = vmatmul.mubr.bf16.vlgmr.msra.gmra.mrb[16].mxu0 %v366_v60  ;;  %v388_v9 = vsub.f32 %v352_v55, %v374_v62  ;;  %v356_v14 = vmul.f32 %v325_v1, %v109_v0  ;;  %v118_v62 = vld [vmem:[%s1486_s1 + $0x68] sm:$0xff] }
 0x108   :  { %v329_v10 = vpop.f32.mrb[6].mxu0  ;;  %v389_v11 = vsub.f32 %v353_v58, %v375_v3  ;;  %v391_v12 = vsub.f32 %v355_v59, %v377_v4  ;;  %v357_v19 = vmul.f32 %v327_v7, %v110_v6  ;;  %v117_v59 = vld [vmem:[%s1486_s1 + $0x60] sm:$0xff] }
 0x109   :  { %v358_v15 = vmul.f32 %v329_v10, %v111_v2  ;;  %v331_v16 = vpop.f32.mrb[7].mxu0  ;;  %v402_v17 = vpack.c.bf16 %v390_v5, %v388_v9 }
 0x10a   :  { %v359_v20 = vmul.f32 %v331_v16, %v112_v8  ;;  %v403_v21 = vpack.c.bf16 %v391_v12, %v389_v11 }
 0x10b   :  { %v1360_v22 = vpack.c.bf16 %v358_v15, %v356_v14 }
 0x10c   :  { %v1362_v23 = vpack.c.bf16 %v359_v20, %v357_v19  ;;  %538 = vmatprep.mubr.bf16.mxu1 %v403_v21 }
 0x10d   :  { %v378_v26 = vunpack.c.l.bf16 %v1360_v22  ;;  %v380_v27 = vunpack.c.h.bf16 %v1360_v22  ;;  %539 = vmatmul.mubr.bf16.vlgmr.msra.gmra.mrb[0].mxu1 %v402_v17 }
 0x10e   :  { %v379_v28 = vunpack.c.l.bf16 %v1362_v23  ;;  %v381_v30 = vunpack.c.h.bf16 %v1362_v23  ;;  %1038 = vmatpush3.bf16.msra.mxu1 %v1206_v13  ;;  %v335_v34 = vpop.f32.mrb[8].mxu0  ;;  %v116_v13 = vld [vmem:[%s1486_s1 + $0x58] sm:$0xff]  ;;  %s1141_s1 = smov 112  }
 0x10f   :  { %v394_v37 = vsub.f32 %v358_v15, %v380_v27  ;;  %v337_v41 = vpop.f32.mrb[9].mxu0  ;;  %1031 = vmatprep.subr.bf16.mxu1 %v1213_v18  ;;  %v392_v43 = vsub.f32 %v356_v14, %v378_v26  ;;  %v360_v51 = vmul.f32 %v335_v34, %v113_v33 }
 0x110   :  { %v395_v48 = vsub.f32 %v359_v20, %v381_v30  ;;  %v339_v49 = vpop.f32.mrb[10].mxu0  ;;  %v393_v50 = vsub.f32 %v357_v19, %v379_v28  ;;  %v361_v55 = vmul.f32 %v337_v41, %v114_v38 }
 0x111   :  { %v362_v52 = vmul.f32 %v339_v49, %v115_v35  ;;  %v341_v53 = vpop.f32.mrb[11].mxu0  ;;  %v404_v54 = vpack.c.bf16 %v394_v37, %v392_v43 }
 0x112   :  { %v363_v56 = vmul.f32 %v341_v53, %v116_v13  ;;  %1039 = vmatpush3.bf16.msra.mxu1 %v1225_v24  ;;  %v405_v57 = vpack.c.bf16 %v395_v48, %v393_v50 }
 0x113   :  { %v370_v58 = vpack.c.bf16 %v362_v52, %v360_v51  ;;  %1032 = vmatprep.subr.bf16.mxu1 %v1231_v25 }
 0x114   :  { %v371_v18 = vpack.c.bf16 %v363_v56, %v361_v55  ;;  %546 = vmatprep.mubr.bf16.mxu1 %v405_v57 }
 0x115   :  { %v382_v60 = vunpack.c.l.bf16 %v370_v58  ;;  %v384_v61 = vunpack.c.h.bf16 %v370_v58  ;;  %547 = vmatmul.mubr.bf16.gmra.mrb[4].mxu1 %v404_v54 }
 0x116   :  { %v383_v63 = vunpack.c.l.bf16 %v371_v18  ;;  %v385_v0 = vunpack.c.h.bf16 %v371_v18  ;;  %1040 = vmatpush3.bf16.msra.mxu1 %v1239_v29  ;;  %v345_v24 = vpop.f32.mrb[12].mxu0 }
 0x117   :  { %v398_v1 = vsub.f32 %v362_v52, %v384_v61  ;;  %v364_v25 = vmul.f32 %v345_v24, %v117_v59  ;;  %v347_v2 = vpop.f32.mrb[13].mxu0  ;;  %1033 = vmatprep.subr.bf16.mxu1 %v1247_v31  ;;  %v396_v3 = vsub.f32 %v360_v51, %v382_v60 }
 0x118   :  { %v399_v4 = vsub.f32 %v363_v56, %v385_v0  ;;  %v365_v5 = vmul.f32 %v347_v2, %v118_v62  ;;  %v349_v6 = vpop.f32.mrb[14].mxu0  ;;  %v397_v7 = vsub.f32 %v361_v55, %v383_v63 }
 0x119   :  { %v372_v8 = vpack.c.bf16 %v364_v25, %v364_v25  ;;  %v350_v9 = vpop.f32.mrb[15].mxu0  ;;  %v406_v10 = vpack.c.bf16 %v398_v1, %v396_v3 }
 0x11a   :  { %v373_v11 = vpack.c.bf16 %v365_v5, %v365_v5  ;;  %1041 = vmatpush3.bf16.msra.mxu1 %v1252_v32  ;;  %v407_v12 = vpack.c.bf16 %v399_v4, %v397_v7 }
 0x11b   :  { %v386_v14 = vunpack.c.l.bf16 %v372_v8  ;;  %1034 = vmatprep.subr.bf16.mxu1 %v1261_v36 }
 0x11c   :  { %v387_v29 = vunpack.c.l.bf16 %v373_v11  ;;  %554 = vmatprep.mubr.bf16.mxu1 %v407_v12 }
 0x11d   :  { %555 = vmatmul.mubr.bf16.gmra.mrb[8].mxu1 %v406_v10  ;;  %v400_v31 = vsub.f32 %v364_v25, %v386_v14 }
 0x11e   :  { %v401_v15 = vsub.f32 %v365_v5, %v387_v29  ;;  %1042 = vmatpush3.bf16.msra.mxu1 %v1268_v39 }
 0x11f   :  { %1035 = vmatprep.subr.bf16.mxu1 %v1273_v40  ;;  %v408_v17 = vpack.c.bf16 %v400_v31, %v400_v31 }
 0x120   :  { %v409_v16 = vpack.c.bf16 %v401_v15, %v401_v15 }
 0x122   :  { %1043 = vmatpush3.bf16.msra.mxu1 %v1281_v42  ;;  %562 = vmatprep.mubr.bf16.mxu1 %v409_v16 }
 0x123   :  { %1036 = vmatprep.subr.bf16.mxu1 %v1310_v44 }
 0x125   :  { %563 = vmatmul.mubr.bf16.gmra.mrb[12].mxu1 %v408_v17 }
 0x126   :  { %1044 = vmatpush3.bf16.msra.mxu1 %v1315_v45  ;;  %610 = vmatprep.mubr.bf16.mxu1 %v1362_v23 }
 0x127   :  { %1037 = vmatprep.subr.bf16.mxu1 %v1324_v46 }
 0x12a   :  { %1045 = vmatpush3.bf16.msra.mxu1 %v1329_v47 }
 0x12d   :  { %611 = vmatmul.mubr.bf16.vlgmr.msra.gmra.mrb[16].mxu1 %v1360_v22 }
 0x12e   :  { %618 = vmatprep.mubr.bf16.mxu1 %v371_v18 }
 0x135   :  { %619 = vmatmul.mubr.bf16.gmra.mrb[20].mxu1 %v370_v58 }
 0x136   :  { %626 = vmatprep.mubr.bf16.mxu1 %v373_v11 }
 0x13d   :  { %627 = vmatmul.mubr.bf16.gmra.mrb[24].mxu1 %v372_v8 }
 0x1da   :  { %v1006_v32 = vpop.f32.mrb[16].mxu0 }
 0x1db   :  { %v1007_v36 = vpop.f32.mrb[17].mxu0 }
 0x1dc   :  { %v1008_v39 = vadd.f32 %v1007_v36, %v1006_v32  ;;  %v1009_v40 = vpop.f32.mrb[18].mxu0 }
 0x1dd   :  { %v1010_v42 = vpop.f32.mrb[19].mxu0 }
 0x1de   :  { %v1011_v44 = vadd.f32 %v1010_v42, %v1009_v40 }
 0x1e0   :  { %v966_v19 = vpop.f32.mrb[0].mxu1 }
 0x1e1   :  { %v967_v45 = vpop.f32.mrb[1].mxu1 }
 0x1e2   :  { %v968_v20 = vadd.f32 %v967_v45, %v966_v19  ;;  %v969_v21 = vpop.f32.mrb[2].mxu1 }
 0x1e3   :  { %v970_v23 = vpop.f32.mrb[3].mxu1 }
 0x1e4   :  { %v1403_v46 = vadd.f32 %v1008_v39, %v968_v20  ;;  %v971_v47 = vadd.f32 %v970_v23, %v969_v21  ;;  %v1143_v23 = vmov 0.0  }
 0x1e5   :  { %91 = vst.msk [vmem:[#allocation2] sm:$0xff] %vm90_vm0, %v1143_v23  ;;  %92 = vst.msk [vmem:[#allocation2 + $0x8] sm:$0xff] %vm90_vm0, %v1143_v23 }
 0x1e6   :  { %v1405_v26 = vadd.f32 %v1011_v44, %v971_v47  ;;  %641 = vrot.lane.b32.xlu0 %v1403_v46, %s1141_s1  ;;  %93 = vst.msk [vmem:[#allocation2 + $0x10] sm:$0xff] %vm90_vm0, %v1143_v23  ;;  %94 = vst.msk [vmem:[#allocation2 + $0x18] sm:$0xff] %vm90_vm0, %v1143_v23 }
 0x1e7   :  { %95 = vst.msk [vmem:[#allocation2 + $0x20] sm:$0xff] %vm90_vm0, %v1143_v23  ;;  %96 = vst.msk [vmem:[#allocation2 + $0x28] sm:$0xff] %vm90_vm0, %v1143_v23 }
 0x1e8   :  { %v972_v22 = vpop.f32.mrb[4].mxu1  ;;  %97 = vst.msk [vmem:[#allocation2 + $0x30] sm:$0xff] %vm90_vm0, %v1143_v23 }
 0x1e9   :  { %v973_v27 = vpop.f32.mrb[5].mxu1 }
 0x1ea   :  { %v974_v28 = vadd.f32 %v973_v27, %v972_v22  ;;  %v975_v30 = vpop.f32.mrb[6].mxu1  ;;  %643 = vrot.lane.b32.xlu0 %v1405_v26, %s1141_s1 }
 0x1eb   :  { %v976_v33 = vpop.f32.mrb[7].mxu1 }
 0x1ec   :  { %v977_v34 = vadd.f32 %v976_v33, %v975_v30 }
 0x1f0   :  { %v978_v35 = vpop.f32.mrb[8].mxu1 }
 0x1f1   :  { %v979_v37 = vpop.f32.mrb[9].mxu1 }
 0x1f2   :  { %v980_v38 = vadd.f32 %v979_v37, %v978_v35  ;;  %v981_v41 = vpop.f32.mrb[10].mxu1 }
 0x1f3   :  { %v982_v13 = vpop.f32.mrb[11].mxu1 }
 0x1f4   :  { %v983_v43 = vadd.f32 %v982_v13, %v981_v41 }
 0x1f8   :  { %v984_v48 = vpop.f32.mrb[12].mxu1 }
 0x1f9   :  { %v985_v49 = vpop.f32.mrb[13].mxu1 }
 0x1fa   :  { %v986_v50 = vadd.f32 %v985_v49, %v984_v48  ;;  %v987_v51 = vpop.f32.mrb[14].mxu1 }
 0x1fb   :  { %v988_v52 = vpop.f32.mrb[15].mxu1 }
 0x200   :  { %v1012_v53 = vpop.f32.mrb[16].mxu1 }
 0x201   :  { %v1013_v54 = vpop.f32.mrb[17].mxu1 }
 0x202   :  { %v1014_v55 = vadd.f32 %v1013_v54, %v1012_v53  ;;  %v1015_v56 = vpop.f32.mrb[18].mxu1 }
 0x203   :  { %v1016_v57 = vpop.f32.mrb[19].mxu1 }
 0x204   :  { %v1411_v58 = vadd.f32 %v1014_v55, %v974_v28  ;;  %v1017_v18 = vadd.f32 %v1016_v57, %v1015_v56 }
 0x206   :  { %v1413_v59 = vadd.f32 %v1017_v18, %v977_v34  ;;  %645 = vrot.lane.b32.xlu1 %v1411_v58, %s1141_s1 }
 0x208   :  { %v1018_v60 = vpop.f32.mrb[20].mxu1 }
 0x209   :  { %v1019_v61 = vpop.f32.mrb[21].mxu1 }
 0x20a   :  { %v1020_v62 = vadd.f32 %v1019_v61, %v1018_v60  ;;  %v1021_v63 = vpop.f32.mrb[22].mxu1  ;;  %647 = vrot.lane.b32.xlu1 %v1413_v59, %s1141_s1 }
 0x20b   :  { %v1022_v0 = vpop.f32.mrb[23].mxu1 }
 0x20c   :  { %v1419_v24 = vadd.f32 %v1020_v62, %v980_v38  ;;  %v1023_v1 = vadd.f32 %v1022_v0, %v1021_v63 }
 0x20e   :  { %v1421_v25 = vadd.f32 %v1023_v1, %v983_v43  ;;  %649 = vrot.lane.b32.xlu0 %v1419_v24, %s1141_s1 }
 0x210   :  { %v1024_v2 = vpop.f32.mrb[24].mxu1  ;;  %651 = vrot.lane.b32.xlu1 %v1421_v25, %s1141_s1 }
 0x211   :  { %v1025_v3 = vpop.f32.mrb[25].mxu1 }
 0x212   :  { %v1026_v4 = vadd.f32 %v1025_v3, %v1024_v2  ;;  %v1027_v5 = vpop.f32.mrb[26].mxu1 }
 0x213   :  { %v1028_v6 = vpop.f32.mrb[27].mxu1 }
 0x214   :  { %v1427_v7 = vadd.f32 %v1026_v4, %v986_v50 }
 0x216   :  { %653 = vrot.lane.b32.xlu0 %v1427_v7, %s1141_s1 }
 0x258   :  { %v642_v8 = vpop.permute.xlu0 %641 }
 0x259   :  { %v662_v9 = vsub.f32 %v1403_v46, %v642_v8 }
 0x25b   :  { %v669_v10 = vadd.f32 1.0, %v662_v9 }
 0x25c   :  { %v644_v11 = vpop.permute.xlu0 %643 }
 0x25d   :  { %v663_v12 = vsub.f32 %v1405_v26, %v644_v11  ;;  %683 = vrot.lane.b32.xlu1 %v669_v10, %s1142_s9 }
 0x25f   :  { %v670_v14 = vadd.f32 1.0, %v663_v12 }
 0x261   :  { %685 = vrot.lane.b32.xlu0 %v670_v14, %s1142_s9 }
 0x278   :  { %v646_v29 = vpop.permute.xlu1 %645 }
 0x279   :  { %v664_v15 = vsub.f32 %v1411_v58, %v646_v29 }
 0x27b   :  { %v671_v31 = vadd.f32 1.0, %v664_v15 }
 0x27c   :  { %v648_v16 = vpop.permute.xlu1 %647 }
 0x27d   :  { %v665_v17 = vsub.f32 %v1413_v59, %v648_v16  ;;  %687 = vrot.lane.b32.xlu1 %v671_v31, %s1142_s9 }
 0x27f   :  { %v672_v32 = vadd.f32 1.0, %v665_v17 }
 0x280   :  { %v650_v36 = vpop.permute.xlu0 %649 }
 0x281   :  { %v666_v39 = vsub.f32 %v1419_v24, %v650_v36  ;;  %689 = vrot.lane.b32.xlu0 %v672_v32, %s1142_s9 }
 0x282   :  { %v652_v40 = vpop.permute.xlu1 %651 }
 0x283   :  { %v673_v42 = vadd.f32 1.0, %v666_v39  ;;  %v667_v44 = vsub.f32 %v1421_v25, %v652_v40 }
 0x285   :  { %v674_v19 = vadd.f32 1.0, %v667_v44  ;;  %691 = vrot.lane.b32.xlu1 %v673_v42, %s1142_s9 }
 0x287   :  { %693 = vrot.lane.b32.xlu0 %v674_v19, %s1142_s9  ;;  %v783_v19 = vlaneseq }
 0x288   :  { %v654_v45 = vpop.permute.xlu0 %653 }
 0x289   :  { %v668_v20 = vsub.f32 %v1427_v7, %v654_v45 }
 0x28b   :  { %v675_v21 = vadd.f32 1.0, %v668_v20 }
 0x28d   :  { %695 = vrot.lane.b32.xlu1 %v675_v21, %s1142_s9 }
 0x2cf   :  { %v684_v47 = vpop.permute.xlu1 %683 }
 0x2d0   :  { %1088 = vrcp.f32 %v684_v47 }
 0x2d3   :  { %v686_v22 = vpop.permute.xlu0 %685 }
 0x2d4   :  { %1090 = vrcp.f32 %v686_v22 }
 0x2da   :  { %v1089_v27 = vpop.eup %1088 }
 0x2db   :  { %v705_v28 = vmul.f32 %v1089_v27, %v1403_v46 }
 0x2dd   :  { %v718_v30 = vadd.f32 1.0, %v705_v28  ;;  %v721_v37 = vmul.f32 -0.5, %v705_v28  ;;  %v724_v13 = vand.u32 2147483647, %v705_v28 }
 0x2de   :  { %v1091_v33 = vpop.eup %1090 }
 0x2df   :  { %v707_v34 = vmul.f32 %v1091_v33, %v1405_v26  ;;  %1092 = vlog2.f32 %v718_v30  ;;  %v722_v38 = vadd.f32 1.0, %v721_v37  ;;  %vm725_vm1 = vcmp.lt.f32.partialorder %v724_v13, 0.0004427343 }
 0x2e1   :  { %v727_v35 = vadd.f32 1.0, %v707_v34  ;;  %v730_v41 = vmul.f32 -0.5, %v707_v34  ;;  %v723_v49 = vmul.f32 %v722_v38, %v705_v28  ;;  %v733_v51 = vand.u32 2147483647, %v707_v34 }
 0x2e2   :  { %v784_v28 = vshrl.u32 %v783_v19, 7 }
 0x2e3   :  { %1094 = vlog2.f32 %v727_v35  ;;  %v731_v50 = vadd.f32 1.0, %v730_v41  ;;  %vm734_vm2 = vcmp.lt.f32.partialorder %v733_v51, 0.0004427343 }
 0x2e4   :  { %v790_v41 = vadd.s32 48, %v784_v28 }
 0x2e5   :  { %v732_v54 = vmul.f32 %v731_v50, %v707_v34 }
 0x2e6   :  { %vm805_vm7 = vcmp.lt.s32.totalorder %v790_v41, 50 }
 0x2e9   :  { %v1093_v43 = vpop.eup %1092 }
 0x2ea   :  { %v720_v48 = vmul.f32 0.6931472, %v1093_v43 }
 0x2ec   :  { %v726_v52 = vsel %vm725_vm1, %v723_v49, %v720_v48 }
 0x2ed   :  { %v1095_v53 = vpop.eup %1094  ;;  %827 = vrot.lane.b32.xlu0 %v726_v52, %s1141_s1  ;;  %v813_v52 = vld [vmem:[#allocation2] sm:$0xff] }
 0x2ee   :  { %v729_v46 = vmul.f32 0.6931472, %v1095_v53 }
 0x2ef   :  { %v688_v26 = vpop.permute.xlu1 %687 }
 0x2f0   :  { %1096 = vrcp.f32 %v688_v26  ;;  %v735_v55 = vsel %vm734_vm2, %v732_v54, %v729_v46  ;;  %v814_v54 = vld [vmem:[#allocation2 + $0x8] sm:$0xff] }
 0x2f1   :  { %829 = vrot.lane.b32.xlu1 %v735_v55, %s1141_s1 }
 0x2f3   :  { %v690_v56 = vpop.permute.xlu0 %689 }
 0x2f4   :  { %1098 = vrcp.f32 %v690_v56  ;;  %v815_v56 = vld [vmem:[#allocation2 + $0x10] sm:$0xff] }
 0x2f7   :  { %v692_v57 = vpop.permute.xlu1 %691 }
 0x2f8   :  { %1100 = vrcp.f32 %v692_v57 }
 0x2f9   :  { %v694_v18 = vpop.permute.xlu0 %693 }
 0x2fa   :  { %v1097_v60 = vpop.eup %1096  ;;  %1102 = vrcp.f32 %v694_v18 }
 0x2fb   :  { %v709_v61 = vmul.f32 %v1097_v60, %v1411_v58  ;;  %v816_v60 = vld [vmem:[#allocation2 + $0x18] sm:$0xff] }
 0x2fd   :  { %v736_v62 = vadd.f32 1.0, %v709_v61  ;;  %v739_v4 = vmul.f32 -0.5, %v709_v61  ;;  %v742_v58 = vand.u32 2147483647, %v709_v61 }
 0x2fe   :  { %v1099_v63 = vpop.eup %1098 }
 0x2ff   :  { %v711_v0 = vmul.f32 %v1099_v63, %v1413_v59  ;;  %v696_v1 = vpop.permute.xlu1 %695  ;;  %1104 = vlog2.f32 %v736_v62  ;;  %v740_v10 = vadd.f32 1.0, %v739_v4  ;;  %vm743_vm3 = vcmp.lt.f32.partialorder %v742_v58, 0.0004427343  ;;  %v817_v63 = vld [vmem:[#allocation2 + $0x20] sm:$0xff] }
 0x300   :  { %1106 = vrcp.f32 %v696_v1  ;;  %v818_v1 = vld [vmem:[#allocation2 + $0x28] sm:$0xff] }
 0x301   :  { %v745_v2 = vadd.f32 1.0, %v711_v0  ;;  %v748_v11 = vmul.f32 -0.5, %v711_v0  ;;  %v741_v15 = vmul.f32 %v740_v10, %v709_v61  ;;  %v819_v10 = vld [vmem:[#allocation2 + $0x30] sm:$0xff] }
 0x302   :  { %v1101_v3 = vpop.eup %1100 }
 0x303   :  { %v713_v5 = vmul.f32 %v1101_v3, %v1419_v24  ;;  %1108 = vlog2.f32 %v745_v2  ;;  %v749_v31 = vadd.f32 1.0, %v748_v11  ;;  %v751_v24 = vand.u32 2147483647, %v711_v0 }
 0x304   :  { %v1103_v6 = vpop.eup %1102 }
 0x305   :  { %v715_v8 = vmul.f32 %v1103_v6, %v1421_v25  ;;  %v754_v9 = vadd.f32 1.0, %v713_v5  ;;  %v757_v16 = vmul.f32 -0.5, %v713_v5  ;;  %v750_v42 = vmul.f32 %v749_v31, %v711_v0 }
 0x306   :  { %vm752_vm4 = vcmp.lt.f32.partialorder %v751_v24, 0.0004427343  ;;  %v760_v45 = vand.u32 2147483647, %v713_v5 }
 0x307   :  { %1110 = vlog2.f32 %v754_v9  ;;  %v763_v12 = vadd.f32 1.0, %v715_v8  ;;  %v766_v36 = vmul.f32 -0.5, %v715_v8  ;;  %v758_v44 = vadd.f32 1.0, %v757_v16 }
 0x308   :  { %vm761_vm5 = vcmp.lt.f32.partialorder %v760_v45, 0.0004427343 }
 0x309   :  { %v1105_v14 = vpop.eup %1104  ;;  %1112 = vlog2.f32 %v763_v12  ;;  %v767_v21 = vadd.f32 1.0, %v766_v36  ;;  %v759_v22 = vmul.f32 %v758_v44, %v713_v5 }
 0x30a   :  { %v1107_v59 = vpop.eup %1106  ;;  %v738_v29 = vmul.f32 0.6931472, %v1105_v14 }
 0x30b   :  { %v717_v17 = vmul.f32 %v1107_v59, %v1427_v7  ;;  %v769_v7 = vand.u32 2147483647, %v715_v8  ;;  %v768_v35 = vmul.f32 %v767_v21, %v715_v8 }
 0x30c   :  { %v744_v32 = vsel %vm743_vm3, %v741_v15, %v738_v29 }
 0x30d   :  { %v1109_v25 = vpop.eup %1108  ;;  %831 = vrot.lane.b32.xlu0 %v744_v32, %s1141_s1  ;;  %v772_v39 = vadd.f32 1.0, %v717_v17  ;;  %v775_v27 = vmul.f32 -0.5, %v717_v17  ;;  %vm770_vm6 = vcmp.lt.f32.partialorder %v769_v7, 0.0004427343  ;;  %v778_v13 = vand.u32 2147483647, %v717_v17 }
 0x30e   :  { %v747_v40 = vmul.f32 0.6931472, %v1109_v25 }
 0x30f   :  { %1114 = vlog2.f32 %v772_v39  ;;  %v776_v38 = vadd.f32 1.0, %v775_v27  ;;  %vm779_vm8 = vcmp.lt.f32.partialorder %v778_v13, 0.0004427343 }
 0x310   :  { %v753_v20 = vsel %vm752_vm4, %v750_v42, %v747_v40 }
 0x311   :  { %v1111_v23 = vpop.eup %1110  ;;  %833 = vrot.lane.b32.xlu1 %v753_v20, %s1141_s1  ;;  %v777_v49 = vmul.f32 %v776_v38, %v717_v17 }
 0x312   :  { %v756_v47 = vmul.f32 0.6931472, %v1111_v23 }
 0x313   :  { %v1113_v30 = vpop.eup %1112 }
 0x314   :  { %v762_v33 = vsel %vm761_vm5, %v759_v22, %v756_v47  ;;  %v765_v34 = vmul.f32 0.6931472, %v1113_v30 }
 0x315   :  { %835 = vrot.lane.b32.xlu0 %v762_v33, %s1141_s1 }
 0x316   :  { %v771_v37 = vsel %vm770_vm6, %v768_v35, %v765_v34 }
 0x317   :  { %837 = vrot.lane.b32.xlu1 %v771_v37, %s1141_s1 }
 0x319   :  { %v1115_v43 = vpop.eup %1114 }
 0x31a   :  { %v774_v48 = vmul.f32 0.6931472, %v1115_v43 }
 0x31c   :  { %v780_v50 = vsel %vm779_vm8, %v777_v49, %v774_v48 }
 0x31d   :  { %v812_v51 = vsel %vm805_vm7, %v780_v50, 0.0 }
 0x31e   :  { %839 = vrot.lane.b32.xlu0 %v812_v51, %s1141_s1 }
 0x35f   :  { %v828_v53 = vpop.permute.xlu0 %827 }
 0x360   :  { %v848_v46 = vadd.f32 %v828_v53, %v813_v52 }
 0x362   :  { %855 = vst.msk [vmem:[#allocation2] sm:$0xff] %vm90_vm0, %v848_v46 }
 0x363   :  { %v830_v26 = vpop.permute.xlu1 %829 }
 0x364   :  { %v849_v55 = vadd.f32 %v830_v26, %v814_v54 }
 0x366   :  { %856 = vst.msk [vmem:[#allocation2 + $0x8] sm:$0xff] %vm90_vm0, %v849_v55 }
 0x369   :  { %v865_v6 = vld [vmem:[#allocation2] sm:$0xff] }
 0x36a   :  { %v872_v58 = vsel %vm90_vm0, %v865_v6, 0.0 }
 0x36d   :  { %v866_v5 = vld [vmem:[#allocation2 + $0x8] sm:$0xff] }
 0x36e   :  { %v873_v9 = vsel %vm90_vm0, %v866_v5, 0.0 }
 0x36f   :  { %v874_v59 = vadd.f32 %v873_v9, %v872_v58 }
 0x37f   :  { %v832_v57 = vpop.permute.xlu0 %831 }
 0x380   :  { %v850_v18 = vadd.f32 %v832_v57, %v815_v56 }
 0x382   :  { %857 = vst.msk [vmem:[#allocation2 + $0x10] sm:$0xff] %vm90_vm0, %v850_v18 }
 0x383   :  { %v834_v61 = vpop.permute.xlu1 %833 }
 0x384   :  { %v851_v62 = vadd.f32 %v834_v61, %v816_v60 }
 0x386   :  { %858 = vst.msk [vmem:[#allocation2 + $0x18] sm:$0xff] %vm90_vm0, %v851_v62 }
 0x387   :  { %v836_v0 = vpop.permute.xlu0 %835 }
 0x388   :  { %v852_v2 = vadd.f32 %v836_v0, %v817_v63 }
 0x389   :  { %v838_v3 = vpop.permute.xlu1 %837  ;;  %v867_v8 = vld [vmem:[#allocation2 + $0x10] sm:$0xff] }
 0x38a   :  { %859 = vst.msk [vmem:[#allocation2 + $0x20] sm:$0xff] %vm90_vm0, %v852_v2  ;;  %v853_v4 = vadd.f32 %v838_v3, %v818_v1  ;;  %v875_v12 = vsel %vm90_vm0, %v867_v8, 0.0 }
 0x38b   :  { %v876_v16 = vadd.f32 %v875_v12, %v874_v59 }
 0x38c   :  { %860 = vst.msk [vmem:[#allocation2 + $0x28] sm:$0xff] %vm90_vm0, %v853_v4 }
 0x38d   :  { %v868_v11 = vld [vmem:[#allocation2 + $0x18] sm:$0xff] }
 0x38e   :  { %v877_v31 = vsel %vm90_vm0, %v868_v11, 0.0 }
 0x38f   :  { %v878_v32 = vadd.f32 %v877_v31, %v876_v16 }
 0x390   :  { %v840_v14 = vpop.permute.xlu0 %839 }
 0x391   :  { %v854_v29 = vadd.f32 %v840_v14, %v819_v10  ;;  %v869_v15 = vld [vmem:[#allocation2 + $0x20] sm:$0xff] }
 0x392   :  { %v879_v17 = vsel %vm90_vm0, %v869_v15, 0.0 }
 0x393   :  { %861 = vst.msk [vmem:[#allocation2 + $0x30] sm:$0xff] %vm90_vm0, %v854_v29  ;;  %v870_v24 = vld [vmem:[#allocation2 + $0x28] sm:$0xff]  ;;  %v880_v36 = vadd.f32 %v879_v17, %v878_v32 }
 0x394   :  { %v881_v25 = vsel %vm90_vm0, %v870_v24, 0.0 }
 0x395   :  { %v882_v40 = vadd.f32 %v881_v25, %v880_v36 }
 0x39a   :  { %v871_v39 = vld [vmem:[#allocation2 + $0x30] sm:$0xff] }
 0x39b   :  { %v883_v42 = vsel %vm90_vm0, %v871_v39, 0.0 }
 0x39c   :  { %v884_v44 = vadd.f32 %v883_v42, %v882_v40 }
 0x39e   :  { %885 = vadd.xlane.f32.xlu1 %v884_v44 }
 0x42b   :  { %v886_v19 = vpop.xlane.xlu1 %885 }
 0x42c   :  { %v887_v45 = vrot.slane %v886_v19, 4 }
 0x42e   :  { %v888_v20 = vadd.f32 %v887_v45, %v886_v19 }
 0x430   :  { %v889_v21 = vrot.slane %v888_v20, 2 }
 0x432   :  { %v890_v23 = vadd.f32 %v889_v21, %v888_v20 }
 0x434   :  { %v891_v7 = vrot.slane %v890_v23, 1 }
 0x436   :  { %v892_v47 = vadd.f32 %v891_v7, %v890_v23 }
 0x438   :  { %1062 = vpush %v892_v47 }
 0x469   :  { %s1063_s12 = spop %1062 }
 0x46a   :  { %v894_v22 = vstv %s1063_s12 }
 0x46b   :  { %897 = vst.msk [vmem:[#allocation3] sm:$0x1] %vm896_vm9, %v894_v22 }
 0x46c   :  { %1127 = shalt.err (!%p1124_p4)
}
 0x46d   :  { %s1128_s16 = scalar_lea.hbm %s1489_s4, 16 }
 0x46e   :  { %p1129_p5 = scmp.ne.s32.totalorder %s1489_s4, %s1128_s16  ;;  %p1132_p6 = scmp.lt.u32.totalorder %s1128_s16, %s1489_s4 }
 0x470   :  { %p1134_p7 = pnand %p1132_p6, %p1129_p5 }
 0x472   :  { %1137 = shalt.err (!%p1134_p7)
}
 0x473   :  { %907 = dma.vmem_to_hbm [thread:$0]  %s905_s11, 16, %s1489_s4, [#allocation4]  }
 0x474   :  { %1138 = dma.done.wait [#allocation4], 16  }
 0x475   :  { %1139 = vsyncadd [#allocation4], 4294967280 }
 0x476   :  { %911 = vsyncpa [#allocation4], 1 }

</bundles_post_ra>
